<compile_context>
chip_gen: v7x
topology: tpu7x:2x2x1
jax: 0.10.0
libtpu: 0.0.40
codegen_flags: <defaults>
</compile_context>

<pallas_src>
import math

import jax
import jax.numpy as jnp
from jax.experimental import pallas as pl
from jax.experimental.pallas import tpu as pltpu


def _drop_path_kernel(scale_ref, x_ref, o_ref):
    # scale_ref: (N, 1) per-sample keep/scale factor (x's dtype), broadcast
    # over the lane-dense (N, T) feature chunk.
    o_ref[...] = x_ref[...] * scale_ref[...]


def _per_sample_scale(random_bits, keep_prob, scale_by_keep, dtype):
    """Bernoulli(keep_prob) per sample from an int32 word, optional 1/p scale."""
    u = (random_bits & 0x7FFFFFFF).astype(jnp.float32) * (1.0 / 2147483648.0)
    keep = (u < keep_prob).astype(jnp.float32)
    if scale_by_keep and keep_prob > 0.0:
        scale = keep * (1.0 / keep_prob)
    else:
        scale = keep
    return scale.astype(dtype)


def drop_path(
    x,
    random_bits,
    *,
    drop_prob=0.0,
    scale_by_keep=True,
    training=True,
    tile_bytes=2 * 1024 * 1024,
):
    """Stochastic-depth drop of whole samples.

    x:           (N, ...) array (e.g. NCHW, like the PyTorch module)
    random_bits: (N,) int32, one non-negative random word per sample
    """
    if drop_prob == 0.0 or not training:
        return x  # matches the PyTorch early-exit semantics exactly

    N = x.shape[0]
    F = int(math.prod(x.shape[1:]))
    keep_prob = 1.0 - drop_prob
    itemsize = jnp.dtype(x.dtype).itemsize

    # --- lane-dense tile: (N, T) block, T multiple of 128, ~tile_bytes ---
    LANE = 128
    t = max(LANE, (tile_bytes // max(1, N * itemsize)) // LANE * LANE)
    if F <= t:
        t = F          # single block == full array dims (legal for any F)
        n_chunks = 1
    else:
        n_chunks = pl.cdiv(F, t)   # partial last block is masked by Pallas

    # --- flatten feature axes (free bitcast: contiguous trailing dims) ---
    x2 = x.reshape(N, F)

    # --- per-sample scale vector (trivial JAX), kept in x's dtype ---
    scale = _per_sample_scale(random_bits, keep_prob, scale_by_keep, x.dtype)
    scale = scale.reshape(N, 1)

    out = pl.pallas_call(
        _drop_path_kernel,
        out_shape=jax.ShapeDtypeStruct((N, F), x.dtype),
        grid=(n_chunks,),
        in_specs=[
            pl.BlockSpec((N, 1), lambda j: (0, 0)),   # (N,1) scale, resident
            pl.BlockSpec((N, t), lambda j: (0, j)),   # lane-dense feature chunk
        ],
        out_specs=pl.BlockSpec((N, t), lambda j: (0, j)),
        compiler_params=pltpu.CompilerParams(
            dimension_semantics=("parallel",),
        ),
    )(scale, x2)

    return out.reshape(x.shape)


if __name__ == "__main__":
    key = jax.random.PRNGKey(0)
    kx, kb, kx2 = jax.random.split(key, 3)

    # --- main test: small NCHW, single-block fast path ---
    N, C, H, W = 2, 4, 16, 16
    x = jax.random.normal(kx, (N, C, H, W), dtype=jnp.float32)
    random_bits = jax.random.randint(
        kb, (N,), minval=0, maxval=2**31 - 1, dtype=jnp.int32
    )

    drop_prob = 0.3
    keep_prob = 1.0 - drop_prob

    y = drop_path(
        x, random_bits, drop_prob=drop_prob, scale_by_keep=True, training=True
    )
    y = jax.block_until_ready(y)

    # pure-JAX reference using the same per-sample bernoulli decision
    mask = _per_sample_scale(random_bits, keep_prob, True, jnp.float32)
    y_ref = x * mask.reshape(N, 1, 1, 1)
    assert jnp.allclose(y, y_ref, atol=1e-6), "DropPath kernel mismatch vs reference"

    # --- second test: force the tiled path with a masked partial last block ---
    N2, C2, H2, W2 = 2, 4, 12, 20           # F = 960, not a multiple of 512
    x_b = jax.random.normal(kx2, (N2, C2, H2, W2), dtype=jnp.float32)
    y_b = drop_path(
        x_b, random_bits, drop_prob=drop_prob, scale_by_keep=True, training=True,
        tile_bytes=4096,                     # T = 512 -> 2 chunks, last partial
    )
    y_b = jax.block_until_ready(y_b)
    y_b_ref = x_b * mask.reshape(N2, 1, 1, 1)
    assert jnp.allclose(y_b, y_b_ref, atol=1e-6), "tiled DropPath mismatch"

    # --- eval / p=0 path: identity ---
    y_eval = drop_path(x, random_bits, drop_prob=drop_prob, training=False)
    assert jnp.array_equal(y_eval, x)
    y_p0 = drop_path(x, random_bits, drop_prob=0.0, training=True)
    assert jnp.array_equal(y_p0, x)

    print("KERNEL_OK")
</pallas_src>

<mosaic_0001>
module attributes {stable_mosaic.version = 11 : i64} {
  func.func @_drop_path_kernel(%arg0: i32, %arg1: memref<2x1xf32, #tpu.memory_space<vmem>>, %arg2: memref<2x1024xf32, #tpu.memory_space<vmem>>, %arg3: memref<2x1024xf32, #tpu.memory_space<vmem>>) attributes {dimension_semantics = [#tpu.dimension_semantics<parallel>], iteration_bounds = array<i64: 1>, scalar_prefetch = 0 : i64, scratch_operands = 0 : i64, tpu.core_type = #tpu.core_type<tc>, window_params = [{pipeline_mode = #tpu.pipeline_mode<synchronous>, transform_indices = @transform_0, window_bounds = array<i64: 2, 1>}, {transform_indices = @transform_1, window_bounds = array<i64: 2, 1024>}, {transform_indices = @transform_2, window_bounds = array<i64: 2, 1024>}]} {
    %c0 = arith.constant 0 : index
    %c0_0 = arith.constant 0 : index
    %0 = vector.load %arg2[%c0, %c0_0] : memref<2x1024xf32, #tpu.memory_space<vmem>>, vector<2x1024xf32>
    %c0_1 = arith.constant 0 : index
    %c0_2 = arith.constant 0 : index
    %1 = vector.load %arg1[%c0_1, %c0_2] : memref<2x1xf32, #tpu.memory_space<vmem>>, vector<2x1xf32>
    %2 = vector.broadcast %1 : vector<2x1xf32> to vector<2x1024xf32>
    %3 = arith.mulf %0, %2 : vector<2x1024xf32>
    %c0_3 = arith.constant 0 : index
    %c0_4 = arith.constant 0 : index
    %4 = vector.load %arg3[%c0_3, %c0_4] : memref<2x1024xf32, #tpu.memory_space<vmem>>, vector<2x1024xf32>
    tpu.vector_store %arg3[%c0_3, %c0_4], %3 {strides = array<i32>} : memref<2x1024xf32, #tpu.memory_space<vmem>>, vector<2x1024xf32>,
    return
  }
  func.func @transform_0(%arg0: i32) -> (i32, i32) {
    %c0_i32 = arith.constant 0 : i32
    %c0_i32_0 = arith.constant 0 : i32
    %c0_i32_1 = arith.constant 0 : i32
    return %c0_i32, %c0_i32_0 : i32, i32
  }
  func.func @transform_1(%arg0: i32) -> (i32, i32) {
    %c0_i32 = arith.constant 0 : i32
    %c0_i32_0 = arith.constant 0 : i32
    return %c0_i32, %arg0 : i32, i32
  }
  func.func @transform_2(%arg0: i32) -> (i32, i32) {
    %c0_i32 = arith.constant 0 : i32
    %c0_i32_0 = arith.constant 0 : i32
    return %c0_i32, %arg0 : i32, i32
  }
}

</mosaic_0001>

<bundles_post_ra>
// kernel: tpu_custom_call.1
= control target key start
LH: loop header
LB: loop body
LE: loop exit
PB: predicated region body
PF: predicated region fallthrough
CT: control target
= control target key end

     0   :  { %7 = vsyncpa [#allocation3], 0  ;;  %s157_s0 = inlined_call_operand.vmem [shape: f32[2,1], index: 0, kind: input, shape index: {}]   ;;  %s158_s1 = inlined_call_operand.hbm [shape: f32[2,1024], index: 1, kind: input, shape index: {}]   ;;  %s159_s2 = inlined_call_operand.hbm [shape: f32[2,1024], index: 2, kind: output, shape index: {}]  }
   0x1   :  { %8 = vsyncpa [#allocation4], 0  ;;  %s111_s9 = smov [#allocation2]   ;;  %s63_s13 = scalar_lea.hbm %s158_s1, 256 }
   0x2   :  { %s17_s10 = sshll.u32 %s111_s9, 4  ;;  %p64_p0 = scmp.ne.s32.totalorder %s158_s1, %s63_s13  ;;  %s18_s10 = int_to_ptr.vmem [resolvable:$true] %s17_s10 }
   0x3   :  { %p67_p1 = scmp.lt.u32.totalorder %s63_s13, %s158_s1 }
   0x5   :  { %p69_p2 = pnand %p67_p1, %p64_p0 }
   0x7   :  { %72 = shalt.err (!%p69_p2)
}
   0x8   :  { %s73_s18 = scalar_lea.vmem %s18_s10, 256  ;;  %p78_p4 = scmp.lt.s32.totalorder %s18_s10, %s18_s10 }
   0x9   :  { %p74_p3 = scmp.ne.s32.totalorder %s18_s10, %s73_s18  ;;  %p79_p5 = scmp.lt.s32.totalorder %s73_s18, %s73_s18 }
   0xb   :  { %p80_p6 = por %p79_p5, %p78_p4 }
   0xd   :  { %p81_p7 = pnand %p80_p6, %p74_p3 }
   0xf   :  { %84 = shalt.err (!%p81_p7)
}
  0x10   :  { %20 = dma.hbm_to_vmem [thread:$0]  %s158_s1, 256, %s18_s10, [#allocation3]  }
  0x11   :  { %107 = dma.done.wait [#allocation3], 256  }
  0x12   :  { %108 = vsyncadd [#allocation3], 4294967040  ;;  %v112_v0 = vmov 0   ;;  %v26_v1 = vld [vmem:[%s157_s0] sm:$0x3]  ;;  %v34_v4 = vlaneseq  ;;  %v25_v10 = vld [vmem:[#allocation2 + $0x8] sm:$0xff] }
  0x13   :  { %62 = vset.pattern.permute.xlu0 %v112_v0  ;;  %v113_v2 = vmov 269488144   ;;  %v24_v9 = vld [vmem:[#allocation2] sm:$0xff]  ;;  %s114_s23 = smov [#allocation5]  }
  0x14   :  { %29 = vperm.xlu0 %62, %v26_v1   ;;  %v32_v3 = vunpack.c.l.s4 %v113_v2  ;;  %v35_v6 = vshrl.u32 %v34_v4, 7  ;;  %s49_s1 = sshll.u32 %s114_s23, 4  ;;  %s50_s1 = int_to_ptr.vmem [resolvable:$true] %s49_s1 }
  0x15   :  { %s85_s24 = scalar_lea.vmem %s50_s1, 256  ;;  %p90_p9 = scmp.lt.s32.totalorder %s50_s1, %s50_s1 }
  0x16   :  { %v33_v5 = vunpack.c.0.s8 %v32_v3  ;;  %p86_p8 = scmp.ne.s32.totalorder %s50_s1, %s85_s24  ;;  %p91_p10 = scmp.lt.s32.totalorder %s85_s24, %s85_s24 }
  0x18   :  { %v36_v7 = vsub.s32 %v33_v5, %v35_v6  ;;  %p92_p11 = por %p91_p10, %p90_p9 }
  0x1a   :  { %p93_p12 = pnand %p92_p11, %p86_p8 }
  0x93   :  { %v30_v8 = vpop.permute.xlu0 %29 }
  0x94   :  { %v37_v11 = vrot.slane %v30_v8, %v36_v7 }
  0x96   :  { %v39_v12 = vmul.f32 %v37_v11, %v24_v9  ;;  %v40_v13 = vmul.f32 %v37_v11, %v25_v10 }
  0x98   :  { %41 = vst [vmem:[#allocation5] sm:$0xff] %v39_v12  ;;  %42 = vst [vmem:[#allocation5 + $0x8] sm:$0xff] %v40_v13 }
  0x99   :  { %96 = shalt.err (!%p93_p12)
}
  0x9a   :  { %s97_s26 = scalar_lea.hbm %s159_s2, 256 }
  0x9b   :  { %p98_p13 = scmp.ne.s32.totalorder %s159_s2, %s97_s26  ;;  %p101_p0 = scmp.lt.u32.totalorder %s97_s26, %s159_s2 }
  0x9d   :  { %p103_p1 = pnand %p101_p0, %p98_p13 }
  0x9f   :  { %106 = shalt.err (!%p103_p1)
}
  0xa0   :  { %52 = dma.vmem_to_hbm [thread:$0]  %s50_s1, 256, %s159_s2, [#allocation4]  }
  0xa1   :  { %109 = dma.done.wait [#allocation4], 256  }
  0xa2   :  { %110 = vsyncadd [#allocation4], 4294967040 }
  0xa3   :  { %56 = vsyncpa [#allocation3], 1 }
  0xa4   :  { %57 = vsyncpa [#allocation4], 1 }

</bundles_post_ra>
